<compile_context>
chip_gen: v7x
topology: tpu7x:2x2x1
jax: 0.10.0
libtpu: 0.0.40
codegen_flags: <defaults>
</compile_context>

<pallas_src>
import functools

import jax
import jax.numpy as jnp
from jax.experimental import pallas as pl
from jax.experimental.pallas import tpu as pltpu


def _softmax_lastdim(w):
    # matches torch.nn.functional.softmax over the last dim of a 2D tensor;
    # exact divide so the weights sum to 1 (the recurrence collapse relies on it).
    m = jnp.max(w, axis=-1, keepdims=True)
    e = jnp.exp(w - m)
    return e / jnp.sum(e, axis=-1, keepdims=True)


def _weighted_centroid(a, nb_ref, k):
    # c[b, :] = sum_kk a[b, kk] * nb_ref[kk, b, :]
    # nb_ref is kk-major (k, tb, dim): each nb_ref[kk] is a contiguous,
    # tile-aligned (tb, dim) slab -> k lane-dense VPU FMAs, no sublane-strided
    # reduce and no lane-offset slicing.
    c = a[:, 0:1] * nb_ref[0]
    for kk in range(1, k):
        c = c + a[:, kk:kk + 1] * nb_ref[kk]
    return c


def _search_kernel(e_ref, w_ref, nb1_ref, nb2_ref, out_ref, *, st, k, dim):
    # ---- unpack lane-packed small inputs (static slices) ----
    e1 = e_ref[:, 0 * dim:1 * dim]                    # (tb, dim)
    e2 = e_ref[:, 1 * dim:2 * dim]
    e3 = e_ref[:, 2 * dim:3 * dim]
    a1 = _softmax_lastdim(w_ref[:, 0:k])              # (tb, k)
    a2 = _softmax_lastdim(w_ref[:, k:2 * k])

    # softmax weights sum to 1 => mean_k(a*(cur - nb)) / st == (cur - c_bar)/(k*st)
    inv_k_st = 1.0 / (k * st)

    # ---- stage 1: walk from e1 toward e2 using e1's neighbors ----
    c1 = _weighted_centroid(a1, nb1_ref, k)           # (tb, dim)
    cur = e1
    for _ in range(st):
        cur = cur + (cur - c1) * inv_k_st
    loss = jnp.sqrt(jnp.sum((cur - e2) ** 2, axis=-1, keepdims=True))   # (tb, 1)

    # ---- stage 2: continue toward e3 using e2's neighbors ----
    c2 = _weighted_centroid(a2, nb2_ref, k)
    for _ in range(st):
        cur = cur + (cur - c2) * inv_k_st
    loss = loss + jnp.sqrt(jnp.sum((cur - e3) ** 2, axis=-1, keepdims=True))

    # Per-tile partial sum of losses, splatted into one full (8, 128) block
    # (unmasked vst; ~4 KB HBM writeback per tile regardless of tb).
    tile_sum = jnp.sum(loss)
    out_ref[...] = jnp.full(out_ref.shape, tile_sum, dtype=out_ref.dtype)


def _choose_tb(bs):
    """Largest batch tile that is a multiple of 8, divides bs, is <= 512, and
    keeps the grid >= 2 steps (so both v7x TensorCores get work)."""
    best = None
    cap = min(512, bs)
    for cand in range(8, cap + 1, 8):
        if bs % cand == 0 and bs // cand >= 2:
            best = cand
    return best if best is not None else bs


def _pallas_search(e_pack, w_pack, nb1_knd, nb2_knd, *, st, tb=None):
    bs = e_pack.shape[0]
    dim = e_pack.shape[1] // 3
    k = w_pack.shape[1] // 2
    if tb is None:
        tb = _choose_tb(bs)
    assert bs % tb == 0, (bs, tb)
    n_tiles = bs // tb

    kern = functools.partial(_search_kernel, st=st, k=k, dim=dim)

    grid_spec = pltpu.PrefetchScalarGridSpec(
        num_scalar_prefetch=0,
        grid=(n_tiles,),
        in_specs=[
            pl.BlockSpec((tb, 3 * dim), lambda i: (i, 0)),      # e1|e2|e3 embeddings
            pl.BlockSpec((tb, 2 * k), lambda i: (i, 0)),        # w1|w2 pre-softmax
            pl.BlockSpec((k, tb, dim), lambda i: (0, i, 0)),    # stage-1 neighbor slab
            pl.BlockSpec((k, tb, dim), lambda i: (0, i, 0)),    # stage-2 neighbor slab
        ],
        out_specs=pl.BlockSpec((1, 8, 128), lambda i: (i, 0, 0)),
    )

    # VMEM budget: double-buffered input tiles + output block, with headroom.
    tile_in_bytes = 4 * tb * (3 * dim + 2 * k + 2 * k * dim)
    tile_out_bytes = 4 * 8 * 128
    vmem_limit = int(min(max(4 * (tile_in_bytes + tile_out_bytes) + (4 << 20),
                             8 << 20), 64 << 20))

    out = pl.pallas_call(
        kern,
        out_shape=jax.ShapeDtypeStruct((n_tiles, 8, 128), jnp.float32),
        grid_spec=grid_spec,
        compiler_params=pltpu.CompilerParams(
            dimension_semantics=("parallel",),
            vmem_limit_bytes=vmem_limit),
    )(e_pack, w_pack, nb1_knd, nb2_knd)
    return out[:, 0, 0]                               # one partial loss sum per tile


def init_params(key, node_num, rel_num, dim, k):
    """Deterministic synthetic parameters mirroring BasicDistanceSearch.__init__."""
    k1, k2, k3, k4, k5 = jax.random.split(key, 5)
    emb = jax.random.normal(k1, (node_num, dim), jnp.float32)
    node_embedding = jnp.concatenate(
        [emb, jnp.zeros((1, dim), jnp.float32)], axis=0)          # (node_num+1, dim)
    node_neighbors = jax.random.randint(k2, (node_num + 1, k), 0, node_num + 1)
    rel_neighbors = jax.random.randint(k3, (node_num + 1, k), 0, rel_num + 1)
    node_weight = jax.random.uniform(k4, (node_num + 1,), jnp.float32, 0.0, 1.0)
    rel_weight = jax.random.uniform(k5, (rel_num + 1,), jnp.float32, 0.0, 1.0)
    return dict(
        node_embedding=node_embedding,
        node_neighbors=node_neighbors,
        rel_neighbors=rel_neighbors,
        node_weight=node_weight,
        rel_weight=rel_weight,
    )


def basic_distance_search_forward(params, queries, *, st, tb=None):
    ne = params["node_embedding"].astype(jnp.float32)
    nnb = params["node_neighbors"]
    rnb = params["rel_neighbors"]
    nw = params["node_weight"]
    rw = params["rel_weight"]
    rel_num_p1 = rw.shape[0]

    e1s, r1s, e2s = queries["e1s"], queries["r1s"], queries["e2s"]
    e3s = queries["e3s"]  # r2s unused in the 5-tuple path (matches reference)
    bs = e1s.shape[0]

    # Glue gathers (plain JAX / XLA gather), including the big (bs, k, dim)
    # neighbor-embedding gathers that previously happened via in-kernel DMAs.
    e1_emb, e2_emb, e3_emb = ne[e1s], ne[e2s], ne[e3s]            # (bs, dim)
    e1_nb = nnb[e1s]                                              # (bs, k)
    e2_nb = nnb[e2s]
    nb1 = ne[e1_nb]                                               # (bs, k, dim)
    nb2 = ne[e2_nb]

    # neighbor weight, stage 1: node_weight only (type weight is always None)
    w1 = nw[e1_nb]                                                # (bs, k)

    # get_edge_weight: rs[r] = count of relation r in the batch (batch-global)
    rs = jnp.sum(jax.nn.one_hot(r1s, rel_num_p1, dtype=jnp.float32), axis=0)
    nr2 = rnb[e2s]                                                # (bs, k)
    edge_w = rw[nr2] + (rw * rs)[nr2]
    w2 = nw[e2_nb] + edge_w

    # lane-pack small per-row inputs; neighbor slabs go kk-major so each
    # kk-slab is a tile-aligned (tb, dim) block inside the kernel.
    e_pack = jnp.concatenate([e1_emb, e2_emb, e3_emb], axis=1).astype(jnp.float32)
    w_pack = jnp.concatenate([w1, w2], axis=1).astype(jnp.float32)
    nb1_knd = jnp.transpose(nb1, (1, 0, 2)).astype(jnp.float32)   # (k, bs, dim)
    nb2_knd = jnp.transpose(nb2, (1, 0, 2)).astype(jnp.float32)

    tile_sums = _pallas_search(e_pack, w_pack, nb1_knd, nb2_knd, st=st, tb=tb)
    return jnp.sum(tile_sums) / bs


def _reference_loss(params, queries, *, st):
    """Pure-JAX transcription of the PyTorch forward (for correctness check)."""
    ne, nnb, rnb = params["node_embedding"], params["node_neighbors"], params["rel_neighbors"]
    nw, rw = params["node_weight"], params["rel_weight"]
    e1s, r1s, e2s, e3s = queries["e1s"], queries["r1s"], queries["e2s"], queries["e3s"]
    e1_emb, e2_emb, e3_emb = ne[e1s], ne[e2s], ne[e3s]
    e1_nb, e2_nb = nnb[e1s], nnb[e2s]
    e1_nb_emb, e2_nb_emb = ne[e1_nb], ne[e2_nb]
    a1 = jax.nn.softmax(nw[e1_nb], axis=1)
    rs = jnp.sum(jax.nn.one_hot(r1s, rw.shape[0], dtype=jnp.float32), axis=0)
    nr2 = rnb[e2s]
    a2 = jax.nn.softmax(nw[e2_nb] + rw[nr2] + (rw * rs)[nr2], axis=1)
    cur = e1_emb
    for _ in range(st):
        cur = cur + jnp.mean(a1[:, :, None] * (cur[:, None, :] - e1_nb_emb), axis=1) / st
    losses = jnp.sqrt(jnp.sum((cur - e2_emb) ** 2, axis=-1))
    for _ in range(st):
        cur = cur + jnp.mean(a2[:, :, None] * (cur[:, None, :] - e2_nb_emb), axis=1) / st
    losses = losses + jnp.sqrt(jnp.sum((cur - e3_emb) ** 2, axis=-1))
    return jnp.mean(losses)


if __name__ == "__main__":
    node_num, rel_num, dim, k, st, bs = 48, 6, 32, 8, 2, 16   # bs=16, TB=8 -> grid (2,)

    key = jax.random.PRNGKey(0)
    pkey, qkey = jax.random.split(key)
    params = init_params(pkey, node_num, rel_num, dim, k)

    q1, q2, q3, q4, q5 = jax.random.split(qkey, 5)
    queries = {
        "e1s": jax.random.randint(q1, (bs,), 0, node_num),
        "r1s": jax.random.randint(q2, (bs,), 0, rel_num),
        "e2s": jax.random.randint(q3, (bs,), 0, node_num),
        "r2s": jax.random.randint(q4, (bs,), 0, rel_num),
        "e3s": jax.random.randint(q5, (bs,), 0, node_num),
    }

    loss = basic_distance_search_forward(params, queries, st=st)
    loss = jax.block_until_ready(loss)

    ref = jax.block_until_ready(_reference_loss(params, queries, st=st))
    assert jnp.isfinite(loss), "non-finite loss"
    assert abs(float(loss) - float(ref)) < 1e-3 + 1e-3 * abs(float(ref)), (
        float(loss), float(ref))

    print("KERNEL_OK")
</pallas_src>

<mosaic_0001>
module attributes {stable_mosaic.version = 11 : i64} {
  func.func @_search_kernel(%arg0: i32, %arg1: memref<8x96xf32, #tpu.memory_space<vmem>>, %arg2: memref<8x16xf32, #tpu.memory_space<vmem>>, %arg3: memref<8x8x32xf32, #tpu.memory_space<vmem>>, %arg4: memref<8x8x32xf32, #tpu.memory_space<vmem>>, %arg5: memref<1x8x128xf32, #tpu.memory_space<vmem>>) attributes {dimension_semantics = [#tpu.dimension_semantics<parallel>], iteration_bounds = array<i64: 2>, scalar_prefetch = 0 : i64, scratch_operands = 0 : i64, tpu.core_type = #tpu.core_type<tc>, window_params = [{transform_indices = @transform_0, window_bounds = array<i64: 8, 96>}, {transform_indices = @transform_1, window_bounds = array<i64: 8, 16>}, {transform_indices = @transform_2, window_bounds = array<i64: 8, 8, 32>}, {transform_indices = @transform_3, window_bounds = array<i64: 8, 8, 32>}, {transform_indices = @transform_4, window_bounds = array<i64: 1, 8, 128>}]} {
    %c0 = arith.constant 0 : index
    %c0_0 = arith.constant 0 : index
    %0 = vector.load %arg1[%c0, %c0_0] : memref<8x96xf32, #tpu.memory_space<vmem>>, vector<8x32xf32>
    %c0_1 = arith.constant 0 : index
    %c32 = arith.constant 32 : index
    %1 = vector.load %arg1[%c0_1, %c32] : memref<8x96xf32, #tpu.memory_space<vmem>>, vector<8x32xf32>
    %c0_2 = arith.constant 0 : index
    %c64 = arith.constant 64 : index
    %2 = vector.load %arg1[%c0_2, %c64] : memref<8x96xf32, #tpu.memory_space<vmem>>, vector<8x32xf32>
    %c0_3 = arith.constant 0 : index
    %c0_4 = arith.constant 0 : index
    %3 = vector.load %arg2[%c0_3, %c0_4] : memref<8x16xf32, #tpu.memory_space<vmem>>, vector<8x8xf32>
    %cst = arith.constant dense<0xFF800000> : vector<8xf32>
    %4 = vector.multi_reduction <maximumf>, %3, %cst [1] : vector<8x8xf32> to vector<8xf32>
    %5 = vector.shape_cast %4 : vector<8xf32> to vector<8x1xf32>
    %6 = vector.broadcast %5 : vector<8x1xf32> to vector<8x8xf32>
    %7 = arith.subf %3, %6 : vector<8x8xf32>
    %8 = math.exp %7 : vector<8x8xf32>
    %cst_5 = arith.constant dense<0.000000e+00> : vector<8xf32>
    %9 = vector.multi_reduction <add>, %8, %cst_5 [1] : vector<8x8xf32> to vector<8xf32>
    %10 = vector.shape_cast %9 : vector<8xf32> to vector<8x1xf32>
    %11 = vector.broadcast %10 : vector<8x1xf32> to vector<8x8xf32>
    %12 = arith.divf %8, %11 : vector<8x8xf32>
    %c0_6 = arith.constant 0 : index
    %c8 = arith.constant 8 : index
    %13 = vector.load %arg2[%c0_6, %c8] : memref<8x16xf32, #tpu.memory_space<vmem>>, vector<8x8xf32>
    %cst_7 = arith.constant dense<0xFF800000> : vector<8xf32>
    %14 = vector.multi_reduction <maximumf>, %13, %cst_7 [1] : vector<8x8xf32> to vector<8xf32>
    %15 = vector.shape_cast %14 : vector<8xf32> to vector<8x1xf32>
    %16 = vector.broadcast %15 : vector<8x1xf32> to vector<8x8xf32>
    %17 = arith.subf %13, %16 : vector<8x8xf32>
    %18 = math.exp %17 : vector<8x8xf32>
    %cst_8 = arith.constant dense<0.000000e+00> : vector<8xf32>
    %19 = vector.multi_reduction <add>, %18, %cst_8 [1] : vector<8x8xf32> to vector<8xf32>
    %20 = vector.shape_cast %19 : vector<8xf32> to vector<8x1xf32>
    %21 = vector.broadcast %20 : vector<8x1xf32> to vector<8x8xf32>
    %22 = arith.divf %18, %21 : vector<8x8xf32>
    %23 = vector.extract_strided_slice %12 {offsets = [0, 0], sizes = [8, 1], strides = [1, 1]} : vector<8x8xf32> to vector<8x1xf32>
    %c0_9 = arith.constant 0 : index
    %c0_10 = arith.constant 0 : index
    %c0_11 = arith.constant 0 : index
    %24 = vector.load %arg3[%c0_9, %c0_10, %c0_11] : memref<8x8x32xf32, #tpu.memory_space<vmem>>, vector<1x8x32xf32>
    %25 = vector.shape_cast %24 : vector<1x8x32xf32> to vector<8x32xf32>
    %26 = vector.broadcast %23 : vector<8x1xf32> to vector<8x32xf32>
    %27 = arith.mulf %26, %25 : vector<8x32xf32>
    %28 = vector.extract_strided_slice %12 {offsets = [0, 1], sizes = [8, 1], strides = [1, 1]} : vector<8x8xf32> to vector<8x1xf32>
    %c1 = arith.constant 1 : index
    %c0_12 = arith.constant 0 : index
    %c0_13 = arith.constant 0 : index
    %29 = vector.load %arg3[%c1, %c0_12, %c0_13] : memref<8x8x32xf32, #tpu.memory_space<vmem>>, vector<1x8x32xf32>
    %30 = vector.shape_cast %29 : vector<1x8x32xf32> to vector<8x32xf32>
    %31 = vector.broadcast %28 : vector<8x1xf32> to vector<8x32xf32>
    %32 = arith.mulf %31, %30 : vector<8x32xf32>
    %33 = arith.addf %27, %32 : vector<8x32xf32>
    %34 = vector.extract_strided_slice %12 {offsets = [0, 2], sizes = [8, 1], strides = [1, 1]} : vector<8x8xf32> to vector<8x1xf32>
    %c2 = arith.constant 2 : index
    %c0_14 = arith.constant 0 : index
    %c0_15 = arith.constant 0 : index
    %35 = vector.load %arg3[%c2, %c0_14, %c0_15] : memref<8x8x32xf32, #tpu.memory_space<vmem>>, vector<1x8x32xf32>
    %36 = vector.shape_cast %35 : vector<1x8x32xf32> to vector<8x32xf32>
    %37 = vector.broadcast %34 : vector<8x1xf32> to vector<8x32xf32>
    %38 = arith.mulf %37, %36 : vector<8x32xf32>
    %39 = arith.addf %33, %38 : vector<8x32xf32>
    %40 = vector.extract_strided_slice %12 {offsets = [0, 3], sizes = [8, 1], strides = [1, 1]} : vector<8x8xf32> to vector<8x1xf32>
    %c3 = arith.constant 3 : index
    %c0_16 = arith.constant 0 : index
    %c0_17 = arith.constant 0 : index
    %41 = vector.load %arg3[%c3, %c0_16, %c0_17] : memref<8x8x32xf32, #tpu.memory_space<vmem>>, vector<1x8x32xf32>
    %42 = vector.shape_cast %41 : vector<1x8x32xf32> to vector<8x32xf32>
    %43 = vector.broadcast %40 : vector<8x1xf32> to vector<8x32xf32>
    %44 = arith.mulf %43, %42 : vector<8x32xf32>
    %45 = arith.addf %39, %44 : vector<8x32xf32>
    %46 = vector.extract_strided_slice %12 {offsets = [0, 4], sizes = [8, 1], strides = [1, 1]} : vector<8x8xf32> to vector<8x1xf32>
    %c4 = arith.constant 4 : index
    %c0_18 = arith.constant 0 : index
    %c0_19 = arith.constant 0 : index
    %47 = vector.load %arg3[%c4, %c0_18, %c0_19] : memref<8x8x32xf32, #tpu.memory_space<vmem>>, vector<1x8x32xf32>
    %48 = vector.shape_cast %47 : vector<1x8x32xf32> to vector<8x32xf32>
    %49 = vector.broadcast %46 : vector<8x1xf32> to vector<8x32xf32>
    %50 = arith.mulf %49, %48 : vector<8x32xf32>
    %51 = arith.addf %45, %50 : vector<8x32xf32>
    %52 = vector.extract_strided_slice %12 {offsets = [0, 5], sizes = [8, 1], strides = [1, 1]} : vector<8x8xf32> to vector<8x1xf32>
    %c5 = arith.constant 5 : index
    %c0_20 = arith.constant 0 : index
    %c0_21 = arith.constant 0 : index
    %53 = vector.load %arg3[%c5, %c0_20, %c0_21] : memref<8x8x32xf32, #tpu.memory_space<vmem>>, vector<1x8x32xf32>
    %54 = vector.shape_cast %53 : vector<1x8x32xf32> to vector<8x32xf32>
    %55 = vector.broadcast %52 : vector<8x1xf32> to vector<8x32xf32>
    %56 = arith.mulf %55, %54 : vector<8x32xf32>
    %57 = arith.addf %51, %56 : vector<8x32xf32>
    %58 = vector.extract_strided_slice %12 {offsets = [0, 6], sizes = [8, 1], strides = [1, 1]} : vector<8x8xf32> to vector<8x1xf32>
    %c6 = arith.constant 6 : index
    %c0_22 = arith.constant 0 : index
    %c0_23 = arith.constant 0 : index
    %59 = vector.load %arg3[%c6, %c0_22, %c0_23] : memref<8x8x32xf32, #tpu.memory_space<vmem>>, vector<1x8x32xf32>
    %60 = vector.shape_cast %59 : vector<1x8x32xf32> to vector<8x32xf32>
    %61 = vector.broadcast %58 : vector<8x1xf32> to vector<8x32xf32>
    %62 = arith.mulf %61, %60 : vector<8x32xf32>
    %63 = arith.addf %57, %62 : vector<8x32xf32>
    %64 = vector.extract_strided_slice %12 {offsets = [0, 7], sizes = [8, 1], strides = [1, 1]} : vector<8x8xf32> to vector<8x1xf32>
    %c7 = arith.constant 7 : index
    %c0_24 = arith.constant 0 : index
    %c0_25 = arith.constant 0 : index
    %65 = vector.load %arg3[%c7, %c0_24, %c0_25] : memref<8x8x32xf32, #tpu.memory_space<vmem>>, vector<1x8x32xf32>
    %66 = vector.shape_cast %65 : vector<1x8x32xf32> to vector<8x32xf32>
    %67 = vector.broadcast %64 : vector<8x1xf32> to vector<8x32xf32>
    %68 = arith.mulf %67, %66 : vector<8x32xf32>
    %69 = arith.addf %63, %68 : vector<8x32xf32>
    %70 = arith.subf %0, %69 : vector<8x32xf32>
    %cst_26 = arith.constant 6.250000e-02 : f32
    %71 = vector.broadcast %cst_26 : f32 to vector<8x32xf32>
    %72 = arith.mulf %70, %71 : vector<8x32xf32>
    %73 = arith.addf %0, %72 : vector<8x32xf32>
    %74 = arith.subf %73, %69 : vector<8x32xf32>
    %cst_27 = arith.constant 6.250000e-02 : f32
    %75 = vector.broadcast %cst_27 : f32 to vector<8x32xf32>
    %76 = arith.mulf %74, %75 : vector<8x32xf32>
    %77 = arith.addf %73, %76 : vector<8x32xf32>
    %78 = arith.subf %77, %1 : vector<8x32xf32>
    %79 = arith.mulf %78, %78 : vector<8x32xf32>
    %cst_28 = arith.constant dense<0.000000e+00> : vector<8xf32>
    %80 = vector.multi_reduction <add>, %79, %cst_28 [1] : vector<8x32xf32> to vector<8xf32>
    %81 = vector.shape_cast %80 : vector<8xf32> to vector<8x1xf32>
    %82 = math.sqrt %81 : vector<8x1xf32>
    %83 = vector.extract_strided_slice %22 {offsets = [0, 0], sizes = [8, 1], strides = [1, 1]} : vector<8x8xf32> to vector<8x1xf32>
    %c0_29 = arith.constant 0 : index
    %c0_30 = arith.constant 0 : index
    %c0_31 = arith.constant 0 : index
    %84 = vector.load %arg4[%c0_29, %c0_30, %c0_31] : memref<8x8x32xf32, #tpu.memory_space<vmem>>, vector<1x8x32xf32>
    %85 = vector.shape_cast %84 : vector<1x8x32xf32> to vector<8x32xf32>
    %86 = vector.broadcast %83 : vector<8x1xf32> to vector<8x32xf32>
    %87 = arith.mulf %86, %85 : vector<8x32xf32>
    %88 = vector.extract_strided_slice %22 {offsets = [0, 1], sizes = [8, 1], strides = [1, 1]} : vector<8x8xf32> to vector<8x1xf32>
    %c1_32 = arith.constant 1 : index
    %c0_33 = arith.constant 0 : index
    %c0_34 = arith.constant 0 : index
    %89 = vector.load %arg4[%c1_32, %c0_33, %c0_34] : memref<8x8x32xf32, #tpu.memory_space<vmem>>, vector<1x8x32xf32>
    %90 = vector.shape_cast %89 : vector<1x8x32xf32> to vector<8x32xf32>
    %91 = vector.broadcast %88 : vector<8x1xf32> to vector<8x32xf32>
    %92 = arith.mulf %91, %90 : vector<8x32xf32>
    %93 = arith.addf %87, %92 : vector<8x32xf32>
    %94 = vector.extract_strided_slice %22 {offsets = [0, 2], sizes = [8, 1], strides = [1, 1]} : vector<8x8xf32> to vector<8x1xf32>
    %c2_35 = arith.constant 2 : index
    %c0_36 = arith.constant 0 : index
    %c0_37 = arith.constant 0 : index
    %95 = vector.load %arg4[%c2_35, %c0_36, %c0_37] : memref<8x8x32xf32, #tpu.memory_space<vmem>>, vector<1x8x32xf32>
    %96 = vector.shape_cast %95 : vector<1x8x32xf32> to vector<8x32xf32>
    %97 = vector.broadcast %94 : vector<8x1xf32> to vector<8x32xf32>
    %98 = arith.mulf %97, %96 : vector<8x32xf32>
    %99 = arith.addf %93, %98 : vector<8x32xf32>
    %100 = vector.extract_strided_slice %22 {offsets = [0, 3], sizes = [8, 1], strides = [1, 1]} : vector<8x8xf32> to vector<8x1xf32>
    %c3_38 = arith.constant 3 : index
    %c0_39 = arith.constant 0 : index
    %c0_40 = arith.constant 0 : index
    %101 = vector.load %arg4[%c3_38, %c0_39, %c0_40] : memref<8x8x32xf32, #tpu.memory_space<vmem>>, vector<1x8x32xf32>
    %102 = vector.shape_cast %101 : vector<1x8x32xf32> to vector<8x32xf32>
    %103 = vector.broadcast %100 : vector<8x1xf32> to vector<8x32xf32>
    %104 = arith.mulf %103, %102 : vector<8x32xf32>
    %105 = arith.addf %99, %104 : vector<8x32xf32>
    %106 = vector.extract_strided_slice %22 {offsets = [0, 4], sizes = [8, 1], strides = [1, 1]} : vector<8x8xf32> to vector<8x1xf32>
    %c4_41 = arith.constant 4 : index
    %c0_42 = arith.constant 0 : index
    %c0_43 = arith.constant 0 : index
    %107 = vector.load %arg4[%c4_41, %c0_42, %c0_43] : memref<8x8x32xf32, #tpu.memory_space<vmem>>, vector<1x8x32xf32>
    %108 = vector.shape_cast %107 : vector<1x8x32xf32> to vector<8x32xf32>
    %109 = vector.broadcast %106 : vector<8x1xf32> to vector<8x32xf32>
    %110 = arith.mulf %109, %108 : vector<8x32xf32>
    %111 = arith.addf %105, %110 : vector<8x32xf32>
    %112 = vector.extract_strided_slice %22 {offsets = [0, 5], sizes = [8, 1], strides = [1, 1]} : vector<8x8xf32> to vector<8x1xf32>
    %c5_44 = arith.constant 5 : index
    %c0_45 = arith.constant 0 : index
    %c0_46 = arith.constant 0 : index
    %113 = vector.load %arg4[%c5_44, %c0_45, %c0_46] : memref<8x8x32xf32, #tpu.memory_space<vmem>>, vector<1x8x32xf32>
    %114 = vector.shape_cast %113 : vector<1x8x32xf32> to vector<8x32xf32>
    %115 = vector.broadcast %112 : vector<8x1xf32> to vector<8x32xf32>
    %116 = arith.mulf %115, %114 : vector<8x32xf32>
    %117 = arith.addf %111, %116 : vector<8x32xf32>
    %118 = vector.extract_strided_slice %22 {offsets = [0, 6], sizes = [8, 1], strides = [1, 1]} : vector<8x8xf32> to vector<8x1xf32>
    %c6_47 = arith.constant 6 : index
    %c0_48 = arith.constant 0 : index
    %c0_49 = arith.constant 0 : index
    %119 = vector.load %arg4[%c6_47, %c0_48, %c0_49] : memref<8x8x32xf32, #tpu.memory_space<vmem>>, vector<1x8x32xf32>
    %120 = vector.shape_cast %119 : vector<1x8x32xf32> to vector<8x32xf32>
    %121 = vector.broadcast %118 : vector<8x1xf32> to vector<8x32xf32>
    %122 = arith.mulf %121, %120 : vector<8x32xf32>
    %123 = arith.addf %117, %122 : vector<8x32xf32>
    %124 = vector.extract_strided_slice %22 {offsets = [0, 7], sizes = [8, 1], strides = [1, 1]} : vector<8x8xf32> to vector<8x1xf32>
    %c7_50 = arith.constant 7 : index
    %c0_51 = arith.constant 0 : index
    %c0_52 = arith.constant 0 : index
    %125 = vector.load %arg4[%c7_50, %c0_51, %c0_52] : memref<8x8x32xf32, #tpu.memory_space<vmem>>, vector<1x8x32xf32>
    %126 = vector.shape_cast %125 : vector<1x8x32xf32> to vector<8x32xf32>
    %127 = vector.broadcast %124 : vector<8x1xf32> to vector<8x32xf32>
    %128 = arith.mulf %127, %126 : vector<8x32xf32>
    %129 = arith.addf %123, %128 : vector<8x32xf32>
    %130 = arith.subf %77, %129 : vector<8x32xf32>
    %cst_53 = arith.constant 6.250000e-02 : f32
    %131 = vector.broadcast %cst_53 : f32 to vector<8x32xf32>
    %132 = arith.mulf %130, %131 : vector<8x32xf32>
    %133 = arith.addf %77, %132 : vector<8x32xf32>
    %134 = arith.subf %133, %129 : vector<8x32xf32>
    %cst_54 = arith.constant 6.250000e-02 : f32
    %135 = vector.broadcast %cst_54 : f32 to vector<8x32xf32>
    %136 = arith.mulf %134, %135 : vector<8x32xf32>
    %137 = arith.addf %133, %136 : vector<8x32xf32>
    %138 = arith.subf %137, %2 : vector<8x32xf32>
    %139 = arith.mulf %138, %138 : vector<8x32xf32>
    %cst_55 = arith.constant dense<0.000000e+00> : vector<8xf32>
    %140 = vector.multi_reduction <add>, %139, %cst_55 [1] : vector<8x32xf32> to vector<8xf32>
    %141 = vector.shape_cast %140 : vector<8xf32> to vector<8x1xf32>
    %142 = math.sqrt %141 : vector<8x1xf32>
    %143 = arith.addf %82, %142 : vector<8x1xf32>
    %144 = vector.shape_cast %143 : vector<8x1xf32> to vector<1x8x1xf32>
    %cst_56 = arith.constant dense<0.000000e+00> : vector<1xf32>
    %145 = vector.multi_reduction <add>, %144, %cst_56 [1, 2] : vector<1x8x1xf32> to vector<1xf32>
    %146 = vector.shape_cast %145 : vector<1xf32> to vector<1x1x1xf32>
    %147 = vector.extract %146[0, 0, 0] : f32 from vector<1x1x1xf32>
    %148 = vector.broadcast %147 : f32 to vector<1x8x128xf32>
    %c0_57 = arith.constant 0 : index
    %c0_58 = arith.constant 0 : index
    %c0_59 = arith.constant 0 : index
    %149 = vector.load %arg5[%c0_57, %c0_58, %c0_59] : memref<1x8x128xf32, #tpu.memory_space<vmem>>, vector<1x8x128xf32>
    tpu.vector_store %arg5[%c0_57, %c0_58, %c0_59], %148 {strides = array<i32>} : memref<1x8x128xf32, #tpu.memory_space<vmem>>, vector<1x8x128xf32>,
    return
  }
  func.func @transform_0(%arg0: i32) -> (i32, i32) {
    %c0_i32 = arith.constant 0 : i32
    %c0_i32_0 = arith.constant 0 : i32
    return %arg0, %c0_i32 : i32, i32
  }
  func.func @transform_1(%arg0: i32) -> (i32, i32) {
    %c0_i32 = arith.constant 0 : i32
    %c0_i32_0 = arith.constant 0 : i32
    return %arg0, %c0_i32 : i32, i32
  }
  func.func @transform_2(%arg0: i32) -> (i32, i32, i32) {
    %c0_i32 = arith.constant 0 : i32
    %c0_i32_0 = arith.constant 0 : i32
    %c0_i32_1 = arith.constant 0 : i32
    return %c0_i32, %arg0, %c0_i32_0 : i32, i32, i32
  }
  func.func @transform_3(%arg0: i32) -> (i32, i32, i32) {
    %c0_i32 = arith.constant 0 : i32
    %c0_i32_0 = arith.constant 0 : i32
    %c0_i32_1 = arith.constant 0 : i32
    return %c0_i32, %arg0, %c0_i32_0 : i32, i32, i32
  }
  func.func @transform_4(%arg0: i32) -> (i32, i32, i32) {
    %c0_i32 = arith.constant 0 : i32
    %c0_i32_0 = arith.constant 0 : i32
    %c0_i32_1 = arith.constant 0 : i32
    return %arg0, %c0_i32, %c0_i32_0 : i32, i32, i32
  }
}

</mosaic_0001>

<bundles_post_ra>
// kernel: tpu_custom_call.1
= control target key start
LH: loop header
LB: loop body
LE: loop exit
PB: predicated region body
PF: predicated region fallthrough
CT: control target
= control target key end

     0   :  { %s1397_s0 = inlined_call_operand.hbm [shape: f32[16,96], index: 0, kind: input, shape index: {}]   ;;  %s1398_s1 = inlined_call_operand.hbm [shape: f32[16,16], index: 1, kind: input, shape index: {}]   ;;  %s1399_s2 = inlined_call_operand.hbm [shape: f32[8,16,32], index: 2, kind: input, shape index: {}]   ;;  %s1400_s3 = inlined_call_operand.hbm [shape: f32[8,16,32], index: 3, kind: input, shape index: {}]   ;;  %s1401_s4 = inlined_call_operand.hbm [shape: f32[2,8,128], index: 4, kind: output, shape index: {}]  }
   0x1   :  { %1411 = sst [smem:[#allocation18_spill]] %s1397_s0 }
   0x2   :  { %1412 = sst [smem:[#allocation19_spill]] %s1398_s1 }
   0x3   :  { %9 = vsyncpa [#allocation3], 0 }
   0x4   :  { %11 = vsyncpa [#allocation3 + $0x1], 0 }
   0x5   :  { %12 = vsyncpa [#allocation6], 0 }
   0x6   :  { %14 = vsyncpa [#allocation6 + $0x1], 0 }
   0x7   :  { %15 = vsyncpa [#allocation9], 0 }
   0x8   :  { %17 = vsyncpa [#allocation9 + $0x1], 0 }
   0x9   :  { %18 = vsyncpa [#allocation4], 0 }
   0xa   :  { %20 = vsyncpa [#allocation4 + $0x1], 0  ;;  %s1086_s15 = smov 0   ;;  %s1088_s16 = smov 0  }
   0xb   :  { %s1090_s17 = smov 0   ;;  %s1092_s18 = smov 0  }
   0xc LB: > { %1413 = sst [smem:[#allocation15_spill]] %s1028_s17  ;;  %s1107_s19 = sadd.s32 4294967295, %s1032_s18   ;;  %s1032_s18 = sphi %s1092_s18, %s1432_s18   ;;  %s1028_s17 = sphi %s1090_s17, %s1434_s17   ;;  %s1024_s16 = sphi %s1088_s16, %s1436_s16   ;;  %s1020_s15 = sphi %s1086_s15, %s1435_s15  }
   0xd   : > { %s689_s20 = sadd.s32 4294967294, %s1032_s18   ;;  %s1111_s21 = sadd.s32 1, %s1032_s18  }
   0xe   : > { %1414 = sst [smem:[#allocation16_spill]] %s1111_s21  ;;  %s33_s22 = sadd.s32 1, %s1028_s17 }
   0xf   : > { %s30_s23 = ssub.s32 %s1032_s18, %s1111_s21  ;;  %p40_p0 = scmp.ne.s32.totalorder %s1028_s17, %s1024_s16 }
  0x10   : > { %p31_p1 = scmp.eq.s32.totalorder %s30_s23, 0  ;;  %p41_p2 = scmp.eq.s32.totalorder %s1032_s18, 0 }
  0x11   : > { %p46_p3 = scmp.ne.s32.totalorder %s1024_s16, %s1020_s15  ;;  %p47_p4 = scmp.eq.s32.totalorder %s1107_s19, 0 }
  0x12   : > { %s1123_s24 = scalar_select %p31_p1, %s1028_s17, %s33_s22  }
  0x13   : > { %p42_p5 = por %p41_p2, %p40_p0  ;;  %p1125_p6 = por %p47_p4, %p46_p3 }
  0x14   : > { %1415 = sst [smem:[#allocation17_spill]] %s1123_s24  ;;  %p148_p7 = scmp.eq.s32.totalorder %s1107_s19, 1 }
  0x15   : > { %s1416_s25 = scalar_select %p1125_p6, 1, 0 }
  0x16   : > { %p154_p8 = scmp.eq.s32.totalorder %s689_s20, 1  ;;  %p753_p10 = scmp.lt.s32.totalorder %s1032_s18, 2 }
  0x17   : > { %p1132_p11 = por %p148_p7, %p40_p0  ;;  %s1141_s28 = sand.u32 1, %s1028_s17  }
  0x18   : > { %p1136_p12 = por %p154_p8, %p46_p3  ;;  %s1144_s29 = sshll.u32 %s1032_s18, 7 }
  0x19   : > { %s1417_s26 = scalar_select %p1132_p11, 1, 0 }
  0x1a   : > { %s1418_s27 = scalar_select %p1136_p12, 1, 0 }
  0x1b   : > { %s1404_s30 = sshll.u32 %s1141_s28, 3  ;;  %p1147_p13 = pnand %p753_p10, %p42_p5 }
  0x1c   : > { %s192_s6 = sand.u32 1, %s1032_s18   ;;  %s1420_s1 = sld [smem:[#allocation19_spill]] }
  0x1d   : > { %s1419_s5 = scalar_select %p1147_p13, 1, 0 }
  0x1e   : > { %s196_s10 = scalar_lea.vmem [#allocation5], %s1404_s30  ;;  %s1405_s12 = sshll.u32 %s1141_s28, 6 }
  0x1f   : > { %s203_s11 = sshll.u32 %s196_s10, 4  ;;  %s1163_s13 = scalar_lea.sflag [#allocation6], %s192_s6  ;;  %s1160_s11 = int_to_ptr.vmem [resolvable:$true] %s203_s11 }
  0x20   : > { %p1169_p1 = pneg %p1147_p13 }
  0x22   : > { %s1156_s9 = scalar_lea.hbm %s1420_s1, %s1144_s29  ;;  %s843_s7 = scalar_lea.hbm %s1420_s1, 256 }
  0x23   : > { %s838_s14 = scalar_lea.hbm %s1156_s9, 128  ;;  %p844_p4 = scmp.lt.u32.totalorder %s1156_s9, %s1420_s1 }
  0x24   : > { %p839_p0 = scmp.ne.s32.totalorder %s1156_s9, %s838_s14  ;;  %p845_p5 = scmp.lt.u32.totalorder %s843_s7, %s838_s14 }
  0x25   : > { %p847_p8 = scmp.lt.u32.totalorder %s838_s14, %s1156_s9 }
  0x26   : > { %p841_p2 = pnand %p1169_p1, %p839_p0  ;;  %p846_p7 = por %p845_p5, %p844_p4 }
  0x28   : > { %p842_p3 = pneg %p841_p2  ;;  %p848_p10 = por %p847_p8, %p846_p7 }
  0x2a   : > { %p849_p9 = pnand %p848_p10, %p842_p3 }
  0x2c   : > { %852 = shalt.err (!%p849_p9)
}
  0x2d   : > { %s853_s6 = scalar_lea.vmem %s1160_s11, 128  ;;  %s1034_s22 = smov [#allocation5]  }
  0x2e   : > { %p854_p0 = scmp.ne.s32.totalorder %s1160_s11, %s853_s6  ;;  %s858_s23 = sshll.u32 %s1034_s22, 4  ;;  %s859_s23 = int_to_ptr.vmem [resolvable:$false] %s858_s23 }
  0x2f   : > { %s860_s8 = scalar_lea.vmem %s859_s23, 256  ;;  %p861_p11 = scmp.lt.s32.totalorder %s1160_s11, %s859_s23 }
  0x30   : > { %p856_p2 = pnand %p854_p0, %p1169_p1  ;;  %p862_p6 = scmp.lt.s32.totalorder %s860_s8, %s853_s6 }
  0x32   : > { %p857_p12 = pneg %p856_p2  ;;  %p863_p4 = por %p862_p6, %p861_p11 }
  0x34   : > { %p864_p5 = pnand %p863_p4, %p857_p12 }
  0x36   : > { %867 = shalt.err (!%p864_p5)
}
  0x37   : > { %742 = dma.hbm_to_vmem [thread:$0]  (!%p1147_p13), %s1156_s9, 128, %s1160_s11, %s1163_s13  }
  0x38   : > { %s1197_s10 = scalar_lea.hbm %s1399_s2, %s1144_s29  ;;  %s214_s6 = scalar_lea.vmem [#allocation7], %s1405_s12 }
  0x39   : > { %s220_s22 = sshll.u32 %s214_s6, 4  ;;  %s1205_s30 = scalar_lea.hbm %s1400_s3, %s1144_s29  ;;  %s1207_s22 = int_to_ptr.vmem [resolvable:$true] %s220_s22 }
  0x3a   : > { %p700_p6 = scmp.ge.s32.totalorder %s1032_s18, 1  ;;  %p248_p9 = scmp.lt.s32.totalorder %s1032_s18, 3 }
  0x3b   : > { %s1422_s0 = sld [smem:[#allocation18_spill]]  ;;  %s1424_s7 = sshll.u32 %s1141_s28, 3 }
  0x3c   : > { %p1217_p11 = pnand %p700_p6, %p248_p9  ;;  %s178_s6 = scalar_lea.vmem [#allocation2], %s1424_s7 }
  0x3d   : > { %s185_s23 = sshll.u32 %s178_s6, 4  ;;  %s175_s8 = scalar_lea.sflag [#allocation3], %s1141_s28  ;;  %s186_s23 = int_to_ptr.vmem [resolvable:$true] %s185_s23 }
  0x3e   : > { %s1423_s14 = scalar_select %p1217_p11, 1, 0 }
  0x41   : > { %s1215_s11 = scalar_lea.hbm %s1422_s0, %s1144_s29  ;;  %s873_s9 = scalar_lea.hbm %s1422_s0, 256 }
  0x42   : > { %s868_s12 = scalar_lea.hbm %s1215_s11, 128  ;;  %p874_p8 = scmp.lt.u32.totalorder %s1215_s11, %s1422_s0 }
  0x43   : > { %p869_p12 = scmp.ne.s32.totalorder %s1215_s11, %s868_s12  ;;  %p875_p10 = scmp.lt.u32.totalorder %s873_s9, %s868_s12 }
  0x44   : > { %p877_p2 = scmp.lt.u32.totalorder %s868_s12, %s1215_s11 }
  0x45   : > { %p871_p3 = pnand %p869_p12, %p1169_p1  ;;  %p876_p0 = por %p875_p10, %p874_p8 }
  0x47   : > { %p872_p7 = pneg %p871_p3  ;;  %p878_p4 = por %p877_p2, %p876_p0 }
  0x49   : > { %p879_p5 = pnand %p878_p4, %p872_p7 }
  0x4b   : > { %882 = shalt.err (!%p879_p5)
}
  0x4c   : > { %s883_s7 = scalar_lea.vmem %s186_s23, 128  ;;  %s1035_s6 = smov [#allocation2]  }
  0x4d   : > { %p884_p6 = scmp.ne.s32.totalorder %s186_s23, %s883_s7  ;;  %s888_s21 = sshll.u32 %s1035_s6, 4  ;;  %s889_s21 = int_to_ptr.vmem [resolvable:$false] %s888_s21 }
  0x4e   : > { %s890_s1 = scalar_lea.vmem %s889_s21, 256  ;;  %p891_p3 = scmp.lt.s32.totalorder %s186_s23, %s889_s21 }
  0x4f   : > { %p886_p9 = pnand %p884_p6, %p1169_p1  ;;  %p892_p11 = scmp.lt.s32.totalorder %s890_s1, %s883_s7 }
  0x51   : > { %p887_p12 = pneg %p886_p9  ;;  %p893_p13 = por %p892_p11, %p891_p3 }
  0x53   : > { %p894_p8 = pnand %p893_p13, %p887_p12 }
  0x55   : > { %897 = shalt.err (!%p894_p8)
}
  0x56   : > { %p1425_p10 = scmp.ne.s32.totalorder %s1419_s5, 0  ;;  %s898_s17 = scalar_lea.hbm %s1197_s10, 1024 }
  0x57   : > { %p899_p7 = scmp.ne.s32.totalorder %s1197_s10, %s898_s17  ;;  %s903_s12 = scalar_lea.hbm %s1399_s2, 2048 }
  0x58   : > { %739 = dma.hbm_to_vmem [thread:$0]  (!%p1425_p10), %s1215_s11, 128, %s186_s23, %s175_s8  }
  0x59   : > { %p901_p0 = pnand %p899_p7, %p1169_p1  ;;  %p904_p13 = scmp.lt.u32.totalorder %s1197_s10, %s1399_s2 }
  0x5a   : > { %p905_p11 = scmp.lt.u32.totalorder %s903_s12, %s898_s17  ;;  %p907_p5 = scmp.lt.u32.totalorder %s898_s17, %s1197_s10 }
  0x5b   : > { %p902_p2 = pneg %p901_p0 }
  0x5c   : > { %p906_p4 = por %p905_p11, %p904_p13 }
  0x5e   : > { %p908_p6 = por %p907_p5, %p906_p4 }
  0x60   : > { %p909_p9 = pnand %p908_p6, %p902_p2 }
  0x62   : > { %912 = shalt.err (!%p909_p9)
}
  0x63   : > { %s913_s11 = scalar_lea.vmem %s1207_s22, 1024  ;;  %s1036_s23 = smov [#allocation7]  }
  0x64   : > { %p914_p12 = scmp.ne.s32.totalorder %s1207_s22, %s913_s11  ;;  %s918_s8 = sshll.u32 %s1036_s23, 4  ;;  %s919_s8 = int_to_ptr.vmem [resolvable:$false] %s918_s8 }
  0x65   : > { %s920_s7 = scalar_lea.vmem %s919_s8, 2048  ;;  %p921_p7 = scmp.lt.s32.totalorder %s1207_s22, %s919_s8 }
  0x66   : > { %p916_p3 = pnand %p914_p12, %p1169_p1  ;;  %p922_p0 = scmp.lt.s32.totalorder %s920_s7, %s913_s11 }
  0x68   : > { %p917_p8 = pneg %p916_p3  ;;  %p923_p13 = por %p922_p0, %p921_p7 }
  0x6a   : > { %p924_p11 = pnand %p923_p13, %p917_p8 }
  0x6c   : > { %927 = shalt.err (!%p924_p11)
}
  0x6d   : > { %s1037_s6 = smov 256   ;;  %s1038_s1 = smov 128  }
  0x6e   : > { %s1039_s17 = smov 8   ;;  %s1426_s24 = sshll.u32 %s1141_s28, 6 }
  0x6f   : > { %745 = dma.hbm_to_vmem [thread:$0]  (!%p1425_p10), %s1197_s10, 1024, %s1207_s22, %s1163_s13, %s1037_s6, %s1038_s1, %s1039_s17  }
  0x70   : > { %s234_s21 = scalar_lea.vmem [#allocation8], %s1426_s24  ;;  %s231_s29 = scalar_lea.sflag [#allocation9], %s1141_s28 }
  0x71   : > { %s240_s12 = sshll.u32 %s234_s21, 4  ;;  %s928_s9 = scalar_lea.hbm %s1205_s30, 1024  ;;  %s1268_s12 = int_to_ptr.vmem [resolvable:$true] %s240_s12 }
  0x72   : > { %p929_p2 = scmp.ne.s32.totalorder %s1205_s30, %s928_s9  ;;  %s933_s8 = scalar_lea.hbm %s1400_s3, 2048 }
  0x73   : > { %p934_p6 = scmp.lt.u32.totalorder %s1205_s30, %s1400_s3  ;;  %p935_p9 = scmp.lt.u32.totalorder %s933_s8, %s928_s9 }
  0x74   : > { %p931_p4 = pnand %p929_p2, %p1169_p1  ;;  %p937_p3 = scmp.lt.u32.totalorder %s928_s9, %s1205_s30 }
  0x75   : > { %p936_p12 = por %p935_p9, %p934_p6 }
  0x76   : > { %p932_p5 = pneg %p931_p4 }
  0x77   : > { %p938_p8 = por %p937_p3, %p936_p12 }
  0x79   : > { %p939_p7 = pnand %p938_p8, %p932_p5 }
  0x7b   : > { %942 = shalt.err (!%p939_p7)
}
  0x7c   : > { %s943_s13 = scalar_lea.vmem %s1268_s12, 1024  ;;  %s1040_s10 = smov [#allocation8]  }
  0x7d   : > { %p944_p0 = scmp.ne.s32.totalorder %s1268_s12, %s943_s13  ;;  %s948_s22 = sshll.u32 %s1040_s10, 4  ;;  %s949_s22 = int_to_ptr.vmem [resolvable:$false] %s948_s22 }
  0x7e   : > { %s950_s0 = scalar_lea.vmem %s949_s22, 2048  ;;  %p951_p2 = scmp.lt.s32.totalorder %s1268_s12, %s949_s22 }
  0x7f   : > { %p946_p13 = pnand %p944_p0, %p1169_p1  ;;  %p952_p4 = scmp.lt.s32.totalorder %s950_s0, %s943_s13 }
  0x81   : > { %p947_p11 = pneg %p946_p13  ;;  %p953_p6 = por %p952_p4, %p951_p2 }
  0x83   : > { %p954_p9 = pnand %p953_p6, %p947_p11 }
  0x85   : > { %957 = shalt.err (!%p954_p9)
}
  0x86   : > { %748 = dma.hbm_to_vmem [thread:$0]  (!%p1425_p10), %s1205_s30, 1024, %s1268_s12, %s231_s29, %s1037_s6, %s1038_s1, %s1039_s17  }
  0x87   : > { %p1427_p1 = scmp.ne.s32.totalorder %s1423_s14, 0 }
  0x88   : > { %s1300_s20 = sand.u32 (!%p1427_p1), 1, %s1024_s16   ;;  %p1428_p5 = scmp.ne.s32.totalorder (!%p1427_p1), %s1416_s25, 0 }
  0x89   : > { %252 = sbr.rel (%p1427_p1) target bundleno = 1129 (0x469), region = 36  ;;  %s1303_s24 = sshll.u32 (!%p1427_p1), %s1300_s20, 3 }
  0x8a   : > { %s255_s5 = scalar_lea.sflag (!%p1427_p1), [#allocation3], %s1300_s20  ;;  %s258_s21 = scalar_lea.vmem (!%p1427_p1), [#allocation2], %s1303_s24 }
  0x90   : > { %1003 = dma.done.wait (%p1428_p5), %s255_s5, 128  }
  0x91   : > { %1005 = vsyncadd (%p1428_p5), %s255_s5, 4294967168  ;;  %s263_s28 = sand.u32 1, %s1107_s19   ;;  %s267_s14 = scalar_lea.vmem [#allocation5], %s1303_s24 }
  0x92   : > { %s264_s30 = scalar_lea.sflag [#allocation6], %s263_s28 }
  0x93   : > { %1007 = dma.done.wait (%p1428_p5), %s264_s30, 1152  }
  0x94   : > { %1009 = vsyncadd (%p1428_p5), %s264_s30, 4294966144  ;;  %s703_s6 = sshll.u32 %s1300_s20, 6  ;;  %s282_s17 = scalar_lea.sflag [#allocation9], %s1300_s20 }
  0x95   : > { %s1318_s1 = scalar_lea.vmem [#allocation7], %s703_s6  ;;  %s1321_s12 = scalar_lea.vmem [#allocation8], %s703_s6 }
  0x96   : > { %1011 = dma.done.wait (%p1428_p5), %s282_s17, 1024  }
  0x97   : > { %1013 = vsyncadd (%p1428_p5), %s282_s17, 4294966272  ;;  %vm339_vm0 = vcmask 130112   ;;  %v326_v0 = vld [vmem:[%s267_s14] sm:$0xff]  ;;  %vm327_vm1 = vcmask 64512   ;;  %s1041_s29 = smov 120   ;;  %v1042_v12 = vmov 1  }
  0x98   : > { %v340_v1 = vsel %vm339_vm0, %v326_v0, -inf  ;;  %v328_v2 = vsel %vm327_vm1, %v326_v0, -inf  ;;  %810 = vset.pattern.permute.xlu1 %v1042_v12  ;;  %v1043_v13 = vmov 0   ;;  %v1044_v19 = vmov 3   ;;  %v325_v34 = vld [vmem:[%s258_s21] sm:$0xff]  ;;  %s1057_s25 = smov 64  }
  0x99   : > { %341 = vmax.xlane.f32.xlu0 %v340_v1  ;;  %v1045_v20 = vmov 2   ;;  %v1046_v21 = vmov 4   ;;  %v1047_v22 = vmov 5   ;;  %v1048_v23 = vmov 6   ;;  %s1059_s9 = smov 96   ;;  %v706_v39 = vld [vmem:[%s1318_s1 + $0x8] sm:$0xff] }
  0x9a   : > { %809 = vset.pattern.permute.xlu0 %v1043_v13  ;;  %v1049_v24 = vmov 8   ;;  %v1050_v25 = vmov 7   ;;  %v1051_v26 = vmov 9   ;;  %v1052_v30 = vmov 10   ;;  %v355_v40 = vld [vmem:[%s1318_s1] sm:$0xff]  ;;  %v707_v42 = vld [vmem:[%s1318_s1 + $0x10] sm:$0xff] }
  0x9b   : > { %v1053_v31 = vmov 11   ;;  %v1054_v32 = vmov 12   ;;  %v1055_v33 = vmov 14   ;;  %v1056_v35 = vmov 13   ;;  %v708_v48 = vld [vmem:[%s1318_s1 + $0x18] sm:$0xff]  ;;  %v709_v51 = vld [vmem:[%s1318_s1 + $0x20] sm:$0xff] }
  0x9c   : > { %v1058_v36 = vmov 15   ;;  %v710_v56 = vld [vmem:[%s1318_s1 + $0x28] sm:$0xff]  ;;  %v711_v59 = vld [vmem:[%s1318_s1 + $0x30] sm:$0xff]  ;;  %v712_v61 = vld [vmem:[%s1318_s1 + $0x38] sm:$0xff]  ;;  %vm430_vm2 = vcmask 261120   ;;  %vm526_vm7 = vcmask 7168  }
  0x9d   : > { %329 = vmax.xlane.f32.xlu0 %v328_v2  ;;  %s324_s11 = scalar_lea.vmem [#allocation10], %s1303_s24  ;;  %s721_s8 = sshll.u32 %s1107_s19, 7 }
  0x9e   : > { %s553_s23 = sshll.u32 %s324_s11, 4  ;;  %s1355_s22 = scalar_lea.hbm %s1401_s4, %s721_s8  ;;  %s1350_s23 = int_to_ptr.vmem [resolvable:$true] %s553_s23 }
  0x9f   : > { %s540_s0 = scalar_lea.sflag [#allocation4], %s1300_s20  ;;  %s958_s5 = scalar_lea.vmem %s1350_s23, 128 }
  0xa0   : > { %p959_p10 = scmp.ne.s32.totalorder %s1350_s23, %s958_s5  ;;  %p1429_p12 = scmp.ne.s32.totalorder %s1417_s26, 0 }
  0xa1   : > { %s1060_s19 = smov [#allocation10]  }
  0xa2   : > { %p960_p3 = pnand %p959_p10, %p1429_p12  ;;  %s962_s24 = sshll.u32 %s1060_s19, 4  ;;  %s963_s24 = int_to_ptr.vmem [resolvable:$false] %s962_s24 }
  0xa3   : > { %s964_s21 = scalar_lea.vmem %s963_s24, 256  ;;  %p965_p7 = scmp.lt.s32.totalorder %s1350_s23, %s963_s24 }
  0xa4   : > { %p961_p8 = pneg %p960_p3  ;;  %p966_p0 = scmp.lt.s32.totalorder %s964_s21, %s958_s5 }
  0xa6   : > { %p967_p13 = por %p966_p0, %p965_p7 }
  0xa8   : > { %p968_p11 = pnand %p967_p13, %p961_p8 }
 0x126   : > { %v342_v3 = vpop.xlane.xlu0 %341 }
 0x127   : > { %v343_v4 = vsub.f32 %v326_v0, %v342_v3 }
 0x129   : > { %v344_v5 = vmul.f32 1.442695, %v343_v4  ;;  %v713_v4 = vld [vmem:[%s1321_s12 + $0x8] sm:$0xff] }
 0x12a   : > { %v330_v7 = vpop.xlane.xlu0 %329 }
 0x12b   : > { %826 = vpow2.f32 %v344_v5  ;;  %v331_v8 = vsub.f32 %v326_v0, %v330_v7  ;;  %v441_v5 = vld [vmem:[%s1321_s12] sm:$0xff] }
 0x12d   : > { %v332_v9 = vmul.f32 1.442695, %v331_v8 }
 0x12f   : > { %828 = vpow2.f32 %v332_v9 }
 0x135   : > { %v827_v6 = vpop.eup %826 }
 0x136   : > { %347 = vrot.lane.b32.xlu1 %v827_v6, %s1041_s29 }
 0x139   : > { %v829_v10 = vpop.eup %828 }
 0x13a   : > { %v334_v11 = vsel %vm327_vm1, %v829_v10, 0.0 }
 0x15a   : > { %335 = vadd.xlane.f32.xlu1 %v334_v11  ;;  %v714_v11 = vld [vmem:[%s1321_s12 + $0x10] sm:$0xff] }
 0x1a8   : > { %v348_v14 = vpop.permute.xlu1 %347 }
 0x1a9   : > { %v350_v15 = vsel %vm327_vm1, %v348_v14, 0.0 }
 0x1aa   : > { %351 = vadd.xlane.f32.xlu0 %v350_v15 }
 0x1e7   : > { %v336_v16 = vpop.xlane.xlu1 %335 }
 0x1e8   : > { %830 = vrcp.f32 %v336_v16  ;;  %v715_v16 = vld [vmem:[%s1321_s12 + $0x18] sm:$0xff] }
 0x1f2   : > { %v831_v17 = vpop.eup %830 }
 0x1f3   : > { %v338_v18 = vmul.f32 %v831_v17, %v829_v10 }
 0x1f5   : > { %365 = vperm.xlu1 %810, %v338_v18   ;;  %358 = vperm.xlu0 %809, %v338_v18  }
 0x1f9   : > { %812 = vset.pattern.permute.xlu1 %v1044_v19  ;;  %811 = vset.pattern.permute.xlu0 %v1045_v20  ;;  %v716_v19 = vld [vmem:[%s1321_s12 + $0x20] sm:$0xff] }
 0x1fa   : > { %381 = vperm.xlu1 %812, %v338_v18   ;;  %373 = vperm.xlu0 %811, %v338_v18  }
 0x1fe   : > { %813 = vset.pattern.permute.xlu1 %v1046_v21  ;;  %814 = vset.pattern.permute.xlu0 %v1047_v22 }
 0x1ff   : > { %389 = vperm.xlu1 %813, %v338_v18   ;;  %397 = vperm.xlu0 %814, %v338_v18  }
 0x203   : > { %815 = vset.pattern.permute.xlu1 %v1048_v23  ;;  %817 = vset.pattern.permute.xlu0 %v1049_v24 }
 0x204   : > { %405 = vperm.xlu1 %815, %v338_v18  }
 0x208   : > { %816 = vset.pattern.permute.xlu1 %v1050_v25  ;;  %v717_v25 = vld [vmem:[%s1321_s12 + $0x28] sm:$0xff] }
 0x209   : > { %413 = vperm.xlu1 %816, %v338_v18  }
 0x20d   : > { %818 = vset.pattern.permute.xlu1 %v1051_v26 }
 0x237   : > { %v352_v27 = vpop.xlane.xlu0 %351 }
 0x238   : > { %832 = vrcp.f32 %v352_v27  ;;  %v718_v27 = vld [vmem:[%s1321_s12 + $0x30] sm:$0xff] }
 0x242   : > { %v833_v28 = vpop.eup %832 }
 0x243   : > { %v354_v29 = vmul.f32 %v833_v28, %v827_v6 }
 0x245   : > { %451 = vperm.xlu1 %818, %v354_v29   ;;  %444 = vperm.xlu0 %817, %v354_v29  }
 0x249   : > { %819 = vset.pattern.permute.xlu1 %v1052_v30  ;;  %820 = vset.pattern.permute.xlu0 %v1053_v31 }
 0x24a   : > { %459 = vperm.xlu1 %819, %v354_v29   ;;  %467 = vperm.xlu0 %820, %v354_v29  }
 0x24e   : > { %821 = vset.pattern.permute.xlu1 %v1054_v32  ;;  %823 = vset.pattern.permute.xlu0 %v1055_v33 }
 0x24f   : > { %475 = vperm.xlu1 %821, %v354_v29   ;;  %491 = vperm.xlu0 %823, %v354_v29  }
 0x253   : > { %822 = vset.pattern.permute.xlu1 %v1056_v35  ;;  %510 = vrot.lane.b32.xlu0 %v325_v34, %s1057_s25  ;;  %v719_v35 = vld [vmem:[%s1321_s12 + $0x38] sm:$0xff] }
 0x254   : > { %483 = vperm.xlu1 %822, %v354_v29   ;;  %825 = vset.pattern.permute.xlu0 %v1058_v36 }
 0x258   : > { %824 = vset.pattern.permute.xlu1 %v1058_v36 }
 0x259   : > { %499 = vperm.xlu1 %824, %v354_v29  }
 0x25d   : > { %425 = vrot.lane.b32.xlu1 %v325_v34, %s1059_s9 }
 0x274   : > { %v366_v37 = vpop.permute.xlu1 %365  ;;  %v359_v38 = vpop.permute.xlu0 %358 }
 0x275   : > { %v368_v44 = vmul.f32 %v706_v39, %v366_v37  ;;  %v361_v45 = vmul.f32 %v359_v38, %v355_v40 }
 0x277   : > { %v369_v47 = vadd.f32 %v368_v44, %v361_v45 }
 0x279   : > { %v382_v41 = vpop.permute.xlu1 %381  ;;  %v374_v43 = vpop.permute.xlu0 %373 }
 0x27a   : > { %v376_v46 = vmul.f32 %v707_v42, %v374_v43  ;;  %v384_v52 = vmul.f32 %v708_v48, %v382_v41 }
 0x27c   : > { %v377_v50 = vadd.f32 %v376_v46, %v369_v47 }
 0x27e   : > { %v390_v49 = vpop.permute.xlu1 %389  ;;  %v385_v53 = vadd.f32 %v384_v52, %v377_v50  ;;  %v398_v57 = vpop.permute.xlu0 %397 }
 0x27f   : > { %v392_v54 = vmul.f32 %v709_v51, %v390_v49  ;;  %v400_v60 = vmul.f32 %v710_v56, %v398_v57 }
 0x281   : > { %v393_v58 = vadd.f32 %v392_v54, %v385_v53 }
 0x283   : > { %v406_v55 = vpop.permute.xlu1 %405  ;;  %v401_v63 = vadd.f32 %v400_v60, %v393_v58 }
 0x284   : > { %v408_v0 = vmul.f32 %v711_v59, %v406_v55 }
 0x286   : > { %v409_v2 = vadd.f32 %v408_v0, %v401_v63 }
 0x288   : > { %v414_v62 = vpop.permute.xlu1 %413 }
 0x289   : > { %v416_v1 = vmul.f32 %v712_v61, %v414_v62 }
 0x28b   : > { %v417_v3 = vadd.f32 %v416_v1, %v409_v2 }
 0x28d   : > { %v418_v10 = vsub.f32 %v325_v34, %v417_v3 }
 0x28f   : > { %v419_v15 = vmul.f32 0.0625, %v418_v10 }
 0x291   : > { %v420_v22 = vadd.f32 %v419_v15, %v325_v34 }
 0x293   : > { %v421_v26 = vsub.f32 %v420_v22, %v417_v3 }
 0x295   : > { %v422_v36 = vmul.f32 0.0625, %v421_v26 }
 0x297   : > { %v423_v40 = vadd.f32 %v422_v36, %v420_v22 }
 0x2c4   : > { %v452_v6 = vpop.permute.xlu1 %451  ;;  %v445_v7 = vpop.permute.xlu0 %444 }
 0x2c5   : > { %v454_v8 = vmul.f32 %v713_v4, %v452_v6  ;;  %v447_v9 = vmul.f32 %v445_v7, %v441_v5 }
 0x2c7   : > { %v455_v13 = vadd.f32 %v454_v8, %v447_v9 }
 0x2c9   : > { %v460_v12 = vpop.permute.xlu1 %459  ;;  %v468_v17 = vpop.permute.xlu0 %467 }
 0x2ca   : > { %v462_v14 = vmul.f32 %v714_v11, %v460_v12  ;;  %v470_v20 = vmul.f32 %v715_v16, %v468_v17 }
 0x2cc   : > { %v463_v18 = vadd.f32 %v462_v14, %v455_v13 }
 0x2ce   : > { %v476_v21 = vpop.permute.xlu1 %475  ;;  %v471_v23 = vadd.f32 %v470_v20, %v463_v18  ;;  %v492_v28 = vpop.permute.xlu0 %491 }
 0x2cf   : > { %v478_v24 = vmul.f32 %v716_v19, %v476_v21  ;;  %v494_v32 = vmul.f32 %v718_v27, %v492_v28 }
 0x2d1   : > { %v479_v30 = vadd.f32 %v478_v24, %v471_v23 }
 0x2d2   : > { %v511_v50 = vpop.permute.xlu0 %510 }
 0x2d3   : > { %v484_v29 = vpop.permute.xlu1 %483 }
 0x2d4   : > { %v486_v31 = vmul.f32 %v717_v25, %v484_v29 }
 0x2d6   : > { %v487_v33 = vadd.f32 %v486_v31, %v479_v30 }
 0x2d8   : > { %v500_v37 = vpop.permute.xlu1 %499  ;;  %v495_v38 = vadd.f32 %v494_v32, %v487_v33 }
 0x2d9   : > { %v502_v39 = vmul.f32 %v719_v35, %v500_v37 }
 0x2db   : > { %v503_v41 = vadd.f32 %v502_v39, %v495_v38 }
 0x2dc   : > { %v426_v42 = vpop.permute.xlu1 %425 }
 0x2dd   : > { %v504_v34 = vsub.f32 %v423_v40, %v503_v41  ;;  %v428_v43 = vsub.f32 %v423_v40, %v426_v42 }
 0x2df   : > { %v505_v44 = vmul.f32 0.0625, %v504_v34  ;;  %v429_v45 = vmul.f32 %v428_v43, %v428_v43 }
 0x2e1   : > { %v506_v46 = vadd.f32 %v505_v44, %v423_v40  ;;  %v431_v47 = vsel %vm430_vm2, %v429_v45, 0.0 }
 0x2e2   : > { %432 = vadd.xlane.f32.xlu1 %v431_v47 }
 0x2e3   : > { %v507_v48 = vsub.f32 %v506_v46, %v503_v41 }
 0x2e5   : > { %v508_v49 = vmul.f32 0.0625, %v507_v48 }
 0x2e7   : > { %v509_v51 = vadd.f32 %v508_v49, %v506_v46 }
 0x2e9   : > { %v513_v52 = vsub.f32 %v509_v51, %v511_v50 }
 0x2eb   : > { %v514_v53 = vmul.f32 %v513_v52, %v513_v52 }
 0x2ed   : > { %v515_v54 = vsel %vm430_vm2, %v514_v53, 0.0 }
 0x2ee   : > { %516 = vadd.xlane.f32.xlu0 %v515_v54 }
 0x36f   : > { %v433_v55 = vpop.xlane.xlu1 %432 }
 0x370   : > { %834 = vrsqrt.f32 %v433_v55  ;;  %vm436_vm3 = vcmp.eq.f32.partialorder %v433_v55, inf  ;;  %v439_v62 = vand.u32 2147483648, %v433_v55  ;;  %vm438_vm5 = vcmp.eq.f32.partialorder %v433_v55, 0.0 }
 0x37a   : > { %v835_v57 = vpop.eup %834 }
 0x37b   : > { %v517_v56 = vpop.xlane.xlu0 %516  ;;  %v435_v58 = vmul.f32 %v835_v57, %v433_v55 }
 0x37c   : > { %836 = vrsqrt.f32 %v517_v56  ;;  %vm520_vm4 = vcmp.eq.f32.partialorder %v517_v56, inf  ;;  %v523_v63 = vand.u32 2147483648, %v517_v56  ;;  %vm522_vm6 = vcmp.eq.f32.partialorder %v517_v56, 0.0 }
 0x37d   : > { %v437_v60 = vsel %vm436_vm3, %v433_v55, %v435_v58 }
 0x37e   : > { %v440_v1 = vsel %vm438_vm5, %v439_v62, %v437_v60 }
 0x386   : > { %v837_v59 = vpop.eup %836 }
 0x387   : > { %v519_v61 = vmul.f32 %v837_v59, %v517_v56 }
 0x389   : > { %v521_v0 = vsel %vm520_vm4, %v517_v56, %v519_v61 }
 0x38a   : > { %v524_v2 = vsel %vm522_vm6, %v523_v63, %v521_v0 }
 0x38b   : > { %v525_v3 = vadd.f32 %v524_v2, %v440_v1 }
 0x38d   : > { %v527_v4 = vsel %vm526_vm7, %v525_v3, 0.0 }
 0x38e   : > { %528 = vadd.xlane.f32.xlu0 %v527_v4 }
 0x41b   : > { %v529_v5 = vpop.xlane.xlu0 %528 }
 0x41c   : > { %v530_v6 = vrot.slane %v529_v5, 4 }
 0x41e   : > { %v531_v7 = vadd.f32 %v530_v6, %v529_v5 }
 0x420   : > { %v532_v8 = vrot.slane %v531_v7, 2 }
 0x422   : > { %v533_v9 = vadd.f32 %v532_v8, %v531_v7 }
 0x424   : > { %v534_v10 = vrot.slane %v533_v9, 1 }
 0x426   : > { %v535_v11 = vadd.f32 %v534_v10, %v533_v9 }
 0x428   : > { %724 = vpush %v535_v11 }
 0x459   : > { %s725_s7 = spop %724 }
 0x45a   : > { %v537_v12 = vstv %s725_s7 }
 0x45b   : > { %538 = vst [vmem:[%s324_s11] sm:$0xff] %v537_v12 }
 0x45c   : > { %971 = shalt.err (!%p968_p11)
}
 0x45d   : > { %s972_s20 = scalar_lea.hbm %s1355_s22, 128  ;;  %s976_s14 = scalar_lea.hbm %s1401_s4, 256 }
 0x45e   : > { %p973_p2 = scmp.ne.s32.totalorder %s1355_s22, %s972_s20  ;;  %p977_p9 = scmp.lt.u32.totalorder %s1355_s22, %s1401_s4 }
 0x45f   : > { %p978_p1 = scmp.lt.u32.totalorder %s976_s14, %s972_s20  ;;  %p980_p10 = scmp.lt.u32.totalorder %s972_s20, %s1355_s22 }
 0x460   : > { %p974_p4 = pnand %p973_p2, %p1429_p12 }
 0x461   : > { %p979_p5 = por %p978_p1, %p977_p9 }
 0x462   : > { %p975_p6 = pneg %p974_p4 }
 0x463   : > { %p981_p3 = por %p980_p10, %p979_p5 }
 0x465   : > { %p982_p8 = pnand %p981_p3, %p975_p6 }
 0x467   : > { %985 = shalt.err (!%p982_p8)
}
 0x468   : > { %734 = dma.vmem_to_hbm [thread:$0]  (%p1429_p12), %s1350_s23, 128, %s1355_s22, %s540_s0  }
 0x469 PF: > { %s565_s17 = sand.u32 1, %s1020_s15   ;;  %p1430_p7 = scmp.ne.s32.totalorder %s1418_s27, 0 }
 0x46a   : > { %p1431_p0 = scmp.ge.s32.totalorder %s1032_s18, 2  ;;  %s566_s12 = scalar_lea.sflag [#allocation4], %s565_s17 }
 0x46c   : > { %p750_p13 = pnand %p1431_p0, %p1430_p7 }
 0x46e   : > { %1015 = dma.done.wait (!%p750_p13), %s566_s12, 128  }
 0x46f   : > { %1017 = vsyncadd (!%p750_p13), %s566_s12, 4294967168  ;;  %s1432_s18 = sld [smem:[#allocation16_spill]]  ;;  %s1433_s29 = sld [smem:[#allocation15_spill]] }
 0x470   : > { %s1434_s17 = sld [smem:[#allocation17_spill]]  ;;  %s1435_s15 = smov %s1024_s16 }
 0x475   : > { %p23_p11 = scmp.ge.s32.totalorder %s1432_s18, 4   ;;  %s1436_s16 = smov %s1433_s29 }
 0x477   :  { %25 = sbr.rel (!%p23_p11) target bundleno = 12 (0xc), region = 132 }
 0x47e   :  { %571 = vsyncpa [#allocation3], 1 }
 0x47f   :  { %573 = vsyncpa [#allocation3 + $0x1], 1 }
 0x480   :  { %574 = vsyncpa [#allocation6], 1 }
 0x481   :  { %576 = vsyncpa [#allocation6 + $0x1], 1 }
 0x482   :  { %577 = vsyncpa [#allocation9], 1 }
 0x483   :  { %579 = vsyncpa [#allocation9 + $0x1], 1 }
 0x484   :  { %580 = vsyncpa [#allocation4], 1 }
 0x485   :  { %582 = vsyncpa [#allocation4 + $0x1], 1 }

</bundles_post_ra>
